<compile_context>
chip_gen: v7x
topology: tpu7x:2x2x1
jax: 0.10.0
libtpu: 0.0.40
codegen_flags: <defaults>
</compile_context>

<pallas_src>
import functools

import jax
import jax.numpy as jnp
from jax import lax
from jax.experimental import pallas as pl
from jax.experimental.pallas import tpu as pltpu


# ---------------------------------------------------------------------------
# Fused kernel: `batch_block` batches per grid step.
# ---------------------------------------------------------------------------

def _fused_attention_kernel(x_ref, wqkv_ref, wout_ref, bout_ref, o_ref,
                            *, batch_block, heads, dim_head):
    """x:(Bb,N,D)  wqkv:(D,3*inner)  wout:(inner,D)  bout:(1,D)  o:(Bb,N,D)."""
    inner = heads * dim_head
    Bb = batch_block
    _, N, D = x_ref.shape

    x = x_ref[...]                                                  # (Bb, N, D)
    xf = x.reshape(Bb * N, D)                                       # flatten rows

    # ---- QKV projection on all Bb*N rows at once: one MXU matmul, f32 acc.
    # (softmax scale is already folded into the q columns of wqkv)
    qkv = jnp.dot(xf, wqkv_ref[...],
                  preferred_element_type=jnp.float32).astype(x.dtype)
    qkv = qkv.reshape(Bb, N, 3 * inner)

    # ---- Per-(batch, head) softmax attention via static lane slices.
    #      Bb and heads are tiny & static -> Python unroll is fine here.
    # TODO(synk): switch to lax.fori_loop(unroll=True) / a grid axis if heads
    # grows (bounds vreg live ranges for real-ViT head counts).
    head_outs = []
    for b in range(Bb):
        qkv_b = qkv[b]                                              # (N, 3*inner)
        for h in range(heads):
            lo = h * dim_head
            q = qkv_b[:, lo:lo + dim_head]
            k = qkv_b[:, inner + lo:inner + lo + dim_head]
            v = qkv_b[:, 2 * inner + lo:2 * inner + lo + dim_head]

            # scores = q @ k^T without materializing a transposed copy of k.
            s = lax.dot_general(q, k, (((1,), (1,)), ((), ())),
                                preferred_element_type=jnp.float32)  # (N, N)
            s = s - jnp.max(s, axis=-1, keepdims=True)
            p = jnp.exp(s)
            p = p * pl.reciprocal(jnp.sum(p, axis=-1, keepdims=True),
                                  approx=True)

            # P @ V, accumulated in f32; result stays in vregs (no VMEM slab).
            head_outs.append(
                jnp.dot(p.astype(v.dtype), v,
                        preferred_element_type=jnp.float32).astype(x.dtype))

    # ---- Concatenate heads (lanes) and batches (sublanes) once, then a single
    #      lane-dense output projection + bias over all Bb*N rows.
    attn = jnp.concatenate(
        [jnp.concatenate(head_outs[b * heads:(b + 1) * heads], axis=-1)
         for b in range(Bb)],
        axis=0)                                                     # (Bb*N, inner)
    y = jnp.dot(attn, wout_ref[...], preferred_element_type=jnp.float32)
    y = y + bout_ref[...].astype(jnp.float32)                       # (Bb*N, D)
    o_ref[...] = y.reshape(Bb, N, D).astype(o_ref.dtype)


# ---------------------------------------------------------------------------
# One-time weight layout prep (do this OUTSIDE the per-call path).
# ---------------------------------------------------------------------------

def prepare_attention_params(params, heads, dim_head, dtype=None):
    """Transpose to kernel layout, fold softmax scale into q-weights, cast."""
    inner = heads * dim_head
    scale = float(dim_head) ** (-0.5)
    w_qkv = params["w_qkv"]                       # (3*inner, D), PyTorch layout
    w_qkv = w_qkv.at[:inner].multiply(scale)      # fold scale into q rows
    wqkv = w_qkv.T                                # (D, 3*inner)
    wout = params["w_out"].T                      # (inner, D)
    bout = params["b_out"].reshape(1, -1)         # (1, D)
    if dtype is not None:
        wqkv, wout, bout = (wqkv.astype(dtype), wout.astype(dtype),
                            bout.astype(dtype))
    return {"wqkv": wqkv, "wout": wout, "bout": bout}


# ---------------------------------------------------------------------------
# Wrapper
# ---------------------------------------------------------------------------

def attention_forward(x, prepped, heads, dim_head, batch_block=None):
    """Pallas-backed forward matching PyTorch Attention.forward (project_out=True).

    `prepped` must come from `prepare_attention_params` (one-time layout prep).
    `batch_block` = batches per grid step.  Default keeps >=2 parallel grid
    steps when B >= 2 (feeds both v7x TensorCores); use batch_block=B for a
    single-step grid on v5e/v6e.
    """
    B, N, D = x.shape
    inner = heads * dim_head

    if batch_block is None:
        batch_block = B // 2 if (B >= 2 and B % 2 == 0) else 1
    assert B % batch_block == 0, "batch_block must divide the batch size"
    num_steps = B // batch_block

    kern = functools.partial(_fused_attention_kernel,
                             batch_block=batch_block,
                             heads=heads, dim_head=dim_head)

    return pl.pallas_call(
        kern,
        out_shape=jax.ShapeDtypeStruct((B, N, D), x.dtype),
        grid=(num_steps,),
        in_specs=[
            pl.BlockSpec((batch_block, N, D), lambda b: (b, 0, 0)),  # x block
            pl.BlockSpec((D, 3 * inner), lambda b: (0, 0)),          # weights stay
            pl.BlockSpec((inner, D), lambda b: (0, 0)),              #  VMEM-resident
            pl.BlockSpec((1, D), lambda b: (0, 0)),
        ],
        out_specs=pl.BlockSpec((batch_block, N, D), lambda b: (b, 0, 0)),
        compiler_params=pltpu.CompilerParams(
            dimension_semantics=("parallel",),      # shard batch steps across TCs
            vmem_limit_bytes=48 * 1024 * 1024,      # safe on v5e/v6e/v7x
        ),
    )(x, prepped["wqkv"], prepped["wout"], prepped["bout"])


# ---------------------------------------------------------------------------
# Params + pure-JAX reference
# ---------------------------------------------------------------------------

def init_attention_params(key, dim, heads, dim_head, dtype=jnp.float32):
    """Deterministic synthetic weights matching PyTorch nn.Linear shapes."""
    inner_dim = dim_head * heads
    k1, k2, k3 = jax.random.split(key, 3)
    return {
        # nn.Linear(dim, inner_dim*3, bias=False): weight (3*inner, dim)
        "w_qkv": jax.random.normal(k1, (inner_dim * 3, dim), dtype) * 0.02,
        # nn.Linear(inner_dim, dim): weight (dim, inner), bias (dim,)
        "w_out": jax.random.normal(k2, (dim, inner_dim), dtype) * 0.02,
        "b_out": jax.random.normal(k3, (dim,), dtype) * 0.02,
    }


def attention_forward_ref(x, params, heads, dim_head):
    B, N, D = x.shape
    inner = dim_head * heads
    scale = dim_head ** (-0.5)
    qkv = x @ params["w_qkv"].T
    q, k, v = jnp.split(qkv, 3, axis=-1)

    def to_heads(t):
        return t.reshape(B, N, heads, dim_head).transpose(0, 2, 1, 3)

    q, k, v = map(to_heads, (q, k, v))
    dots = jnp.einsum("bhnd,bhmd->bhnm", q, k) * scale
    attn = jax.nn.softmax(dots, axis=-1)
    out = jnp.einsum("bhnm,bhmd->bhnd", attn, v)
    out = out.transpose(0, 2, 1, 3).reshape(B, N, inner)
    return out @ params["w_out"].T + params["b_out"]


# ---------------------------------------------------------------------------

if __name__ == "__main__":
    # Small shapes consistent with the module: dim=32, heads=2, dim_head=16.
    B, N, D = 2, 8, 32
    HEADS, DIM_HEAD = 2, 16

    key = jax.random.PRNGKey(0)
    kx, kp = jax.random.split(key)
    x = jax.random.normal(kx, (B, N, D), jnp.float32)
    params = init_attention_params(kp, D, HEADS, DIM_HEAD)
    y_ref = attention_forward_ref(x, params, HEADS, DIM_HEAD)

    # One-time weight prep (outside the per-call path).
    prepped = prepare_attention_params(params, HEADS, DIM_HEAD, jnp.float32)

    # (1) default blocking: 2 parallel grid steps (v7x-friendly, 1 batch each).
    fwd_2step = jax.jit(functools.partial(attention_forward,
                                          heads=HEADS, dim_head=DIM_HEAD,
                                          batch_block=1))
    y = jax.block_until_ready(fwd_2step(x, prepped))
    assert y.shape == (B, N, D)
    assert jnp.allclose(y, y_ref, atol=2e-3, rtol=2e-3), "f32 (2-step) mismatch"

    # (2) single-step grid with flattened (B*N) rows (v5e/v6e-friendly).
    fwd_1step = jax.jit(functools.partial(attention_forward,
                                          heads=HEADS, dim_head=DIM_HEAD,
                                          batch_block=B))
    y1 = jax.block_until_ready(fwd_1step(x, prepped))
    assert jnp.allclose(y1, y_ref, atol=2e-3, rtol=2e-3), "f32 (1-step) mismatch"

    # (3) bf16 operands with f32 accumulation (MXU fast path); loose tolerance.
    xb = x.astype(jnp.bfloat16)
    prepped_b = prepare_attention_params(params, HEADS, DIM_HEAD, jnp.bfloat16)
    yb = jax.block_until_ready(attention_forward(xb, prepped_b, HEADS, DIM_HEAD))
    assert yb.dtype == jnp.bfloat16
    assert jnp.allclose(yb.astype(jnp.float32), y_ref, atol=3e-2, rtol=5e-2), \
        "bf16 mismatch vs reference"

    print("KERNEL_OK")
</pallas_src>

<mosaic_0001>
module attributes {stable_mosaic.version = 11 : i64} {
  func.func @_fused_attention_kernel(%arg0: i32, %arg1: memref<1x8x32xf32, #tpu.memory_space<vmem>>, %arg2: memref<32x96xf32, #tpu.memory_space<vmem>>, %arg3: memref<32x32xf32, #tpu.memory_space<vmem>>, %arg4: memref<1x32xf32, #tpu.memory_space<vmem>>, %arg5: memref<1x8x32xf32, #tpu.memory_space<vmem>>) attributes {dimension_semantics = [#tpu.dimension_semantics<parallel>], iteration_bounds = array<i64: 2>, scalar_prefetch = 0 : i64, scratch_operands = 0 : i64, tpu.core_type = #tpu.core_type<tc>, window_params = [{transform_indices = @transform_0, window_bounds = array<i64: 1, 8, 32>}, {pipeline_mode = #tpu.pipeline_mode<synchronous>, transform_indices = @transform_1, window_bounds = array<i64: 32, 96>}, {pipeline_mode = #tpu.pipeline_mode<synchronous>, transform_indices = @transform_2, window_bounds = array<i64: 32, 32>}, {pipeline_mode = #tpu.pipeline_mode<synchronous>, transform_indices = @transform_3, window_bounds = array<i64: 1, 32>}, {transform_indices = @transform_4, window_bounds = array<i64: 1, 8, 32>}]} {
    %c0 = arith.constant 0 : index
    %c0_0 = arith.constant 0 : index
    %c0_1 = arith.constant 0 : index
    %0 = vector.load %arg1[%c0, %c0_0, %c0_1] : memref<1x8x32xf32, #tpu.memory_space<vmem>>, vector<1x8x32xf32>
    %1 = vector.shape_cast %0 : vector<1x8x32xf32> to vector<8x32xf32>
    %c0_2 = arith.constant 0 : index
    %c0_3 = arith.constant 0 : index
    %2 = vector.load %arg2[%c0_2, %c0_3] : memref<32x96xf32, #tpu.memory_space<vmem>>, vector<32x96xf32>
    %cst = arith.constant dense<0.000000e+00> : vector<8x96xf32>
    %3 = tpu.matmul %1, %2, %cst {dimension_numbers = #tpu.dot_dimension_numbers<[1], [0], [0], [1], [0, 0, 1, 1], [], []>} : vector<8x32xf32>, vector<32x96xf32>, vector<8x96xf32> -> vector<8x96xf32>
    %4 = vector.shape_cast %3 : vector<8x96xf32> to vector<1x8x96xf32>
    %5 = vector.shape_cast %4 : vector<1x8x96xf32> to vector<8x96xf32>
    %6 = vector.extract_strided_slice %5 {offsets = [0, 0], sizes = [8, 16], strides = [1, 1]} : vector<8x96xf32> to vector<8x16xf32>
    %7 = vector.extract_strided_slice %5 {offsets = [0, 32], sizes = [8, 16], strides = [1, 1]} : vector<8x96xf32> to vector<8x16xf32>
    %8 = vector.extract_strided_slice %5 {offsets = [0, 64], sizes = [8, 16], strides = [1, 1]} : vector<8x96xf32> to vector<8x16xf32>
    %cst_4 = arith.constant dense<0.000000e+00> : vector<8x8xf32>
    %9 = tpu.matmul %6, %7, %cst_4 {dimension_numbers = #tpu.dot_dimension_numbers<[1], [1], [0], [0], [0, 0, 1, 0], [], []>} : vector<8x16xf32>, vector<8x16xf32>, vector<8x8xf32> -> vector<8x8xf32>
    %cst_5 = arith.constant dense<0xFF800000> : vector<8xf32>
    %10 = vector.multi_reduction <maximumf>, %9, %cst_5 [1] : vector<8x8xf32> to vector<8xf32>
    %11 = vector.shape_cast %10 : vector<8xf32> to vector<8x1xf32>
    %12 = vector.broadcast %11 : vector<8x1xf32> to vector<8x8xf32>
    %13 = arith.subf %9, %12 : vector<8x8xf32>
    %14 = math.exp %13 : vector<8x8xf32>
    %cst_6 = arith.constant dense<0.000000e+00> : vector<8xf32>
    %15 = vector.multi_reduction <add>, %14, %cst_6 [1] : vector<8x8xf32> to vector<8xf32>
    %16 = vector.shape_cast %15 : vector<8xf32> to vector<8x1xf32>
    %17 = tpu.reciprocal %16 {approx = true} : vector<8x1xf32> -> vector<8x1xf32>
    %18 = vector.broadcast %17 : vector<8x1xf32> to vector<8x8xf32>
    %19 = arith.mulf %14, %18 : vector<8x8xf32>
    %cst_7 = arith.constant dense<0.000000e+00> : vector<8x16xf32>
    %20 = tpu.matmul %19, %8, %cst_7 {dimension_numbers = #tpu.dot_dimension_numbers<[1], [0], [0], [1], [0, 0, 1, 1], [], []>} : vector<8x8xf32>, vector<8x16xf32>, vector<8x16xf32> -> vector<8x16xf32>
    %21 = vector.extract_strided_slice %5 {offsets = [0, 16], sizes = [8, 16], strides = [1, 1]} : vector<8x96xf32> to vector<8x16xf32>
    %22 = vector.extract_strided_slice %5 {offsets = [0, 48], sizes = [8, 16], strides = [1, 1]} : vector<8x96xf32> to vector<8x16xf32>
    %23 = vector.extract_strided_slice %5 {offsets = [0, 80], sizes = [8, 16], strides = [1, 1]} : vector<8x96xf32> to vector<8x16xf32>
    %cst_8 = arith.constant dense<0.000000e+00> : vector<8x8xf32>
    %24 = tpu.matmul %21, %22, %cst_8 {dimension_numbers = #tpu.dot_dimension_numbers<[1], [1], [0], [0], [0, 0, 1, 0], [], []>} : vector<8x16xf32>, vector<8x16xf32>, vector<8x8xf32> -> vector<8x8xf32>
    %cst_9 = arith.constant dense<0xFF800000> : vector<8xf32>
    %25 = vector.multi_reduction <maximumf>, %24, %cst_9 [1] : vector<8x8xf32> to vector<8xf32>
    %26 = vector.shape_cast %25 : vector<8xf32> to vector<8x1xf32>
    %27 = vector.broadcast %26 : vector<8x1xf32> to vector<8x8xf32>
    %28 = arith.subf %24, %27 : vector<8x8xf32>
    %29 = math.exp %28 : vector<8x8xf32>
    %cst_10 = arith.constant dense<0.000000e+00> : vector<8xf32>
    %30 = vector.multi_reduction <add>, %29, %cst_10 [1] : vector<8x8xf32> to vector<8xf32>
    %31 = vector.shape_cast %30 : vector<8xf32> to vector<8x1xf32>
    %32 = tpu.reciprocal %31 {approx = true} : vector<8x1xf32> -> vector<8x1xf32>
    %33 = vector.broadcast %32 : vector<8x1xf32> to vector<8x8xf32>
    %34 = arith.mulf %29, %33 : vector<8x8xf32>
    %cst_11 = arith.constant dense<0.000000e+00> : vector<8x16xf32>
    %35 = tpu.matmul %34, %23, %cst_11 {dimension_numbers = #tpu.dot_dimension_numbers<[1], [0], [0], [1], [0, 0, 1, 1], [], []>} : vector<8x8xf32>, vector<8x16xf32>, vector<8x16xf32> -> vector<8x16xf32>
    %36 = tpu.concatenate %20, %35 in 1 : vector<8x16xf32>, vector<8x16xf32> -> vector<8x32xf32>
    %c0_12 = arith.constant 0 : index
    %c0_13 = arith.constant 0 : index
    %37 = vector.load %arg3[%c0_12, %c0_13] : memref<32x32xf32, #tpu.memory_space<vmem>>, vector<32x32xf32>
    %cst_14 = arith.constant dense<0.000000e+00> : vector<8x32xf32>
    %38 = tpu.matmul %36, %37, %cst_14 {dimension_numbers = #tpu.dot_dimension_numbers<[1], [0], [0], [1], [0, 0, 1, 1], [], []>} : vector<8x32xf32>, vector<32x32xf32>, vector<8x32xf32> -> vector<8x32xf32>
    %c0_15 = arith.constant 0 : index
    %c0_16 = arith.constant 0 : index
    %39 = vector.load %arg4[%c0_15, %c0_16] : memref<1x32xf32, #tpu.memory_space<vmem>>, vector<1x32xf32>
    %40 = vector.broadcast %39 : vector<1x32xf32> to vector<8x32xf32>
    %41 = arith.addf %38, %40 : vector<8x32xf32>
    %42 = vector.shape_cast %41 : vector<8x32xf32> to vector<1x8x32xf32>
    %c0_17 = arith.constant 0 : index
    %c0_18 = arith.constant 0 : index
    %c0_19 = arith.constant 0 : index
    %43 = vector.load %arg5[%c0_17, %c0_18, %c0_19] : memref<1x8x32xf32, #tpu.memory_space<vmem>>, vector<1x8x32xf32>
    tpu.vector_store %arg5[%c0_17, %c0_18, %c0_19], %42 {strides = array<i32>} : memref<1x8x32xf32, #tpu.memory_space<vmem>>, vector<1x8x32xf32>,
    return
  }
  func.func @transform_0(%arg0: i32) -> (i32, i32, i32) {
    %c0_i32 = arith.constant 0 : i32
    %c0_i32_0 = arith.constant 0 : i32
    %c0_i32_1 = arith.constant 0 : i32
    return %arg0, %c0_i32, %c0_i32_0 : i32, i32, i32
  }
  func.func @transform_1(%arg0: i32) -> (i32, i32) {
    %c0_i32 = arith.constant 0 : i32
    %c0_i32_0 = arith.constant 0 : i32
    %c0_i32_1 = arith.constant 0 : i32
    return %c0_i32, %c0_i32_0 : i32, i32
  }
  func.func @transform_2(%arg0: i32) -> (i32, i32) {
    %c0_i32 = arith.constant 0 : i32
    %c0_i32_0 = arith.constant 0 : i32
    %c0_i32_1 = arith.constant 0 : i32
    return %c0_i32, %c0_i32_0 : i32, i32
  }
  func.func @transform_3(%arg0: i32) -> (i32, i32) {
    %c0_i32 = arith.constant 0 : i32
    %c0_i32_0 = arith.constant 0 : i32
    %c0_i32_1 = arith.constant 0 : i32
    return %c0_i32, %c0_i32_0 : i32, i32
  }
  func.func @transform_4(%arg0: i32) -> (i32, i32, i32) {
    %c0_i32 = arith.constant 0 : i32
    %c0_i32_0 = arith.constant 0 : i32
    %c0_i32_1 = arith.constant 0 : i32
    return %arg0, %c0_i32, %c0_i32_0 : i32, i32, i32
  }
}

</mosaic_0001>

<bundles_post_ra>
// kernel: attention_forward.1
= control target key start
LH: loop header
LB: loop body
LE: loop exit
PB: predicated region body
PF: predicated region fallthrough
CT: control target
= control target key end

     0   :  { %9 = vsyncpa [#allocation3], 0  ;;  %s1486_s0 = inlined_call_operand.hbm [shape: f32[2,8,32], index: 0, kind: input, shape index: {}]   ;;  %s1487_s1 = inlined_call_operand.hbm [shape: f32[32,96], index: 1, kind: input, shape index: {}]   ;;  %s1488_s2 = inlined_call_operand.hbm [shape: f32[32,32], index: 2, kind: input, shape index: {}]   ;;  %s1489_s3 = inlined_call_operand.vmem [shape: f32[1,32], index: 3, kind: input, shape index: {}]   ;;  %s1490_s4 = inlined_call_operand.hbm [shape: f32[2,8,32], index: 4, kind: output, shape index: {}]  }
   0x1   :  { %11 = vsyncpa [#allocation3 + $0x1], 0 }
   0x2   :  { %12 = vsyncpa [#allocation6], 0 }
   0x3   :  { %13 = vsyncpa [#allocation4], 0 }
   0x4   :  { %15 = vsyncpa [#allocation4 + $0x1], 0  ;;  %s1226_s15 = smov 0   ;;  %s1228_s16 = smov 0  }
   0x5   :  { %s1230_s17 = smov 0   ;;  %s1232_s18 = smov 0  }
   0x6 LB: > { %s1247_s19 = sadd.s32 4294967295, %s1184_s18   ;;  %s845_s20 = sadd.s32 4294967294, %s1184_s18   ;;  %s1184_s18 = sphi %s1232_s18, %s1510_s18   ;;  %s1180_s17 = sphi %s1230_s17, %s1509_s17   ;;  %s1176_s16 = sphi %s1228_s16, %s1508_s16   ;;  %s1172_s15 = sphi %s1226_s15, %s1507_s15  }
   0x7   : > { %p41_p0 = scmp.ne.s32.totalorder %s1176_s16, %s1172_s15  ;;  %p1491_p1 = scmp.eq.s32.totalorder %s1247_s19, 0 }
   0x8   : > { %p134_p3 = scmp.eq.s32.totalorder %s845_s20, 1  ;;  %p846_p5 = scmp.ge.s32.totalorder %s1184_s18, 1 }
   0x9   : > { %p1256_p4 = por %p1491_p1, %p41_p0  ;;  %p141_p7 = scmp.lt.s32.totalorder %s1184_s18, 3 }
   0xa   : > { %p1261_p6 = por %p134_p3, %p41_p0  ;;  %s1186_s24 = smov [#allocation5]  }
   0xb   : > { %s1494_s21 = scalar_select %p1256_p4, 1, 0 }
   0xc   : > { %s1495_s22 = scalar_select %p1261_p6, 1, 0 }
   0xd   : > { %p1266_p8 = pnand %p846_p5, %p141_p7  ;;  %s153_s25 = sshll.u32 %s1186_s24, 4  ;;  %s1270_s25 = int_to_ptr.vmem [resolvable:$true] %s153_s25 }
   0xe   : > { %s1187_s27 = smov [#allocation7]   ;;  %s1028_s5 = scalar_lea.hbm %s1487_s1, 512 }
   0xf   : > { %p954_p9 = pneg %p1266_p8  ;;  %s166_s28 = sshll.u32 %s1187_s27, 4  ;;  %s1281_s28 = int_to_ptr.vmem [resolvable:$true] %s166_s28 }
  0x10   : > { %p1029_p12 = scmp.ne.s32.totalorder %s1487_s1, %s1028_s5  ;;  %p1035_p5 = scmp.lt.u32.totalorder %s1028_s5, %s1487_s1 }
  0x11   : > { %p1277_p11 = pnand %p954_p9, %p1491_p1 }
  0x13   : > { %p1030_p13 = pneg %p1277_p11 }
  0x15   : > { %p1031_p0 = pnand %p1030_p13, %p1029_p12 }
  0x17   : > { %p1032_p3 = pneg %p1031_p0 }
  0x19   : > { %p1037_p7 = pnand %p1035_p5, %p1032_p3 }
  0x1b   : > { %1040 = shalt.err (!%p1037_p7)
}
  0x1c   : > { %s1041_s10 = scalar_lea.vmem %s1270_s25, 512  ;;  %p1049_p2 = scmp.lt.s32.totalorder %s1270_s25, %s1270_s25 }
  0x1d   : > { %p1042_p9 = scmp.ne.s32.totalorder %s1270_s25, %s1041_s10  ;;  %p1050_p12 = scmp.lt.s32.totalorder %s1041_s10, %s1041_s10 }
  0x1f   : > { %p1044_p10 = pnand %p1042_p9, %p1030_p13  ;;  %p1051_p0 = por %p1050_p12, %p1049_p2 }
  0x21   : > { %p1045_p1 = pneg %p1044_p10 }
  0x23   : > { %p1052_p6 = pnand %p1051_p0, %p1045_p1 }
  0x25   : > { %1055 = shalt.err (!%p1052_p6)
}
  0x26   : > { %s1188_s11 = smov 128   ;;  %s1189_s12 = smov 8  }
  0x27   : > { %957 = dma.hbm_to_vmem [thread:$0]  (!%p1277_p11), %s1487_s1, 512, %s1270_s25, [#allocation6], %s1188_s11, %s1188_s11, %s1189_s12  }
  0x28   : > { %s1056_s27 = scalar_lea.hbm %s1488_s2, 512 }
  0x29   : > { %p1057_p2 = scmp.ne.s32.totalorder %s1488_s2, %s1056_s27  ;;  %p1063_p10 = scmp.lt.u32.totalorder %s1056_s27, %s1488_s2 }
  0x2b   : > { %p1059_p1 = pnand %p1057_p2, %p1030_p13 }
  0x2d   : > { %p1060_p6 = pneg %p1059_p1 }
  0x2f   : > { %p1065_p3 = pnand %p1063_p10, %p1060_p6 }
  0x31   : > { %1068 = shalt.err (!%p1065_p3)
}
  0x32   : > { %s1069_s25 = scalar_lea.vmem %s1281_s28, 512  ;;  %p1077_p12 = scmp.lt.s32.totalorder %s1281_s28, %s1281_s28 }
  0x33   : > { %p1070_p5 = scmp.ne.s32.totalorder %s1281_s28, %s1069_s25  ;;  %p1078_p0 = scmp.lt.s32.totalorder %s1069_s25, %s1069_s25 }
  0x35   : > { %p1072_p7 = pnand %p1070_p5, %p1030_p13  ;;  %p1079_p2 = por %p1078_p0, %p1077_p12 }
  0x37   : > { %p1073_p9 = pneg %p1072_p7 }
  0x39   : > { %p1080_p1 = pnand %p1079_p2, %p1073_p9 }
  0x3b   : > { %1083 = shalt.err (!%p1080_p1)
}
  0x3c   : > { %960 = dma.hbm_to_vmem [thread:$0]  (!%p1277_p11), %s1488_s2, 512, %s1281_s28, [#allocation6], %s1188_s11, %s1188_s11, %s1189_s12  }
  0x3d   : > { %s1336_s9 = sadd.s32 1, %s1184_s18   ;;  %s28_s26 = sadd.s32 1, %s1180_s17 }
  0x3e   : > { %s25_s10 = ssub.s32 %s1184_s18, %s1336_s9  ;;  %p35_p13 = scmp.ne.s32.totalorder %s1180_s17, %s1176_s16 }
  0x3f   : > { %p26_p6 = scmp.eq.s32.totalorder %s25_s10, 0  ;;  %p36_p10 = scmp.eq.s32.totalorder %s1184_s18, 0 }
  0x40   : > { %p1498_p3 = scmp.eq.s32.totalorder %s1247_s19, 1  ;;  %p971_p7 = scmp.lt.s32.totalorder %s1184_s18, 2 }
  0x41   : > { %s1352_s14 = scalar_select %p26_p6, %s1180_s17, %s28_s26  }
  0x42   : > { %p1346_p5 = por %p1498_p3, %p35_p13  ;;  %p37_p9 = por %p36_p10, %p35_p13 }
  0x43   : > { %s183_s20 = sand.u32 1, %s1180_s17   ;;  %s851_s28 = sshll.u32 %s1184_s18, 7 }
  0x44   : > { %s1499_s13 = scalar_select %p1346_p5, 1, 0 }
  0x45   : > { %s850_s24 = sshll.u32 %s183_s20, 3  ;;  %s1359_s27 = scalar_lea.hbm %s1486_s0, %s851_s28 }
  0x46   : > { %s187_s29 = scalar_lea.vmem [#allocation2], %s850_s24  ;;  %p1363_p11 = pnand %p971_p7, %p37_p9 }
  0x47   : > { %s194_s30 = sshll.u32 %s187_s29, 4  ;;  %s184_s6 = scalar_lea.sflag [#allocation3], %s183_s20  ;;  %s1361_s30 = int_to_ptr.vmem [resolvable:$true] %s194_s30 }
  0x48   : > { %s1084_s25 = scalar_lea.hbm %s1359_s27, 128  ;;  %p1086_p0 = pneg %p1363_p11 }
  0x49   : > { %p1085_p12 = scmp.ne.s32.totalorder %s1359_s27, %s1084_s25  ;;  %s1089_s26 = scalar_lea.hbm %s1486_s0, 256 }
  0x4a   : > { %p1090_p13 = scmp.lt.u32.totalorder %s1359_s27, %s1486_s0  ;;  %p1091_p6 = scmp.lt.u32.totalorder %s1089_s26, %s1084_s25 }
  0x4b   : > { %p1087_p2 = pnand %p1086_p0, %p1085_p12  ;;  %p1093_p3 = scmp.lt.u32.totalorder %s1084_s25, %s1359_s27 }
  0x4c   : > { %p1092_p10 = por %p1091_p6, %p1090_p13 }
  0x4d   : > { %p1088_p1 = pneg %p1087_p2 }
  0x4e   : > { %p1094_p7 = por %p1093_p3, %p1092_p10 }
  0x50   : > { %p1095_p9 = pnand %p1094_p7, %p1088_p1 }
  0x52   : > { %1098 = shalt.err (!%p1095_p9)
}
  0x53   : > { %s1099_s20 = scalar_lea.vmem %s1361_s30, 128  ;;  %s1190_s28 = smov [#allocation2]  }
  0x54   : > { %p1100_p12 = scmp.ne.s32.totalorder %s1361_s30, %s1099_s20  ;;  %s1104_s11 = sshll.u32 %s1190_s28, 4  ;;  %s1105_s11 = int_to_ptr.vmem [resolvable:$false] %s1104_s11 }
  0x55   : > { %s1106_s12 = scalar_lea.vmem %s1105_s11, 256  ;;  %p1107_p4 = scmp.lt.s32.totalorder %s1361_s30, %s1105_s11 }
  0x56   : > { %p1102_p2 = pnand %p1100_p12, %p1086_p0  ;;  %p1108_p13 = scmp.lt.s32.totalorder %s1106_s12, %s1099_s20 }
  0x58   : > { %p1103_p5 = pneg %p1102_p2  ;;  %p1109_p6 = por %p1108_p13, %p1107_p4 }
  0x5a   : > { %p1110_p10 = pnand %p1109_p6, %p1103_p5 }
  0x5c   : > { %1113 = shalt.err (!%p1110_p10)
}
  0x5d   : > { %964 = dma.hbm_to_vmem [thread:$0]  (!%p1363_p11), %s1359_s27, 128, %s1361_s30, %s184_s6  }
  0x5e   : > { %203 = sbr.rel (%p1266_p8) target bundleno = 2057 (0x809), region = 36  ;;  %s1395_s29 = sand.u32 (!%p1266_p8), 1, %s1176_s16  }
  0x5f   : > { %s853_s25 = sshll.u32 (!%p1266_p8), %s1395_s29, 3  ;;  %s206_s7 = scalar_lea.sflag (!%p1266_p8), [#allocation3], %s1395_s29 }
  0x60   : > { %s209_s8 = scalar_lea.vmem (!%p1266_p8), [#allocation2], %s853_s25  ;;  %p1501_p4 = scmp.ne.s32.totalorder (!%p1266_p8), %s1494_s21, 0 }
  0x65   : > { %1159 = dma.done.wait (%p1501_p4), %s206_s7, 128  }
  0x66   : > { %1161 = vsyncadd (%p1501_p4), %s206_s7, 4294967168  ;;  %p1502_p5 = scmp.eq.s32.totalorder %s1247_s19, 0 }
  0x68   : > { %1163 = dma.done.wait (%p1502_p5), [#allocation6], 1024   ;;  %p1503_p8 = pmov %p1502_p5 }
  0x69   : > { %v1191_v0 = vmov 0.0|0.0   ;;  %vm1192_vm0 = vmmov 0   ;;  %v1193_v1 = vmov 0.0   ;;  %v243_v2 = vld [vmem:[#allocation5] sm:$0xff]  ;;  %v244_v3 = vld [vmem:[#allocation5 + $0x8] sm:$0xff]  ;;  %v245_v4 = vld [vmem:[#allocation5 + $0x10] sm:$0xff] }
  0x6a   : > { %1165 = vsyncadd (%p1503_p8), [#allocation6], 4294966272  ;;  %930 = vmatprep.subr.bf16.mxu0 %v1191_v0  ;;  %896 = vmatprep.mubr.msk.f32.mxu0 %vm1192_vm0, %v1193_v1  ;;  %v931_v5 = vpack.c.bf16 %v244_v3, %v243_v2  ;;  %v246_v6 = vld [vmem:[#allocation5 + $0x18] sm:$0xff]  ;;  %vm247_vm1 = vcmask 261120   ;;  %s1194_s21 = smov 64   ;;  %s1195_s23 = smov 96  }
  0x6b   : > { %899 = vmatprep.subr.mxu1 %v1193_v1  ;;  %901 = vmatprep.mubr.msk.f32.mxu1 %vm1192_vm0, %v1193_v1  ;;  %v934_v7 = vpack.c.bf16 %v246_v6, %v245_v4  ;;  %v242_v8 = vld [vmem:[%s209_s8] sm:$0xff]  ;;  %s1196_s27 = smov 80   ;;  %vm324_vm2 = vcmask 130048   ;;  %vm399_vm3 = vcmask 64512   ;;  %s1197_s30 = smov 112   ;;  %v657_v40 = vld [vmem:[#allocation7] sm:$0xff] }
  0x6c   : > { %932 = vmatpush3.bf16.msra.mxu0 %v931_v5  ;;  %s1198_s5 = smov 48   ;;  %v658_v41 = vld [vmem:[#allocation7 + $0x8] sm:$0xff]  ;;  %v659_v42 = vld [vmem:[#allocation7 + $0x10] sm:$0xff]  ;;  %v660_v44 = vld [vmem:[#allocation7 + $0x18] sm:$0xff]  ;;  %s1199_s6 = smov 16  }
  0x6d   : > { %933 = vmatprep.subr.bf16.mxu0 %v1191_v0  ;;  %v937_v43 = vpack.c.bf16 %v658_v41, %v657_v40  ;;  %v940_v45 = vpack.c.bf16 %v660_v44, %v659_v42  ;;  %v864_v50 = vld [vmem:[%s1489_s3] ss:$0 sm:$0xff]  ;;  %s867_s24 = sshll.u32 %s1247_s19, 7  ;;  %s241_s20 = scalar_lea.vmem [#allocation8], %s853_s25 }
  0x6e   : > { %s756_s28 = sshll.u32 %s241_s20, 4  ;;  %s1441_s7 = scalar_lea.hbm %s1490_s4, %s867_s24  ;;  %s1443_s28 = int_to_ptr.vmem [resolvable:$true] %s756_s28 }
  0x6f   : > { %s743_s8 = scalar_lea.sflag [#allocation4], %s1395_s29  ;;  %s1114_s19 = scalar_lea.vmem %s1443_s28, 128 }
  0x70   : > { %935 = vmatpush3.bf16.msra.mxu0 %v934_v7  ;;  %p1115_p11 = scmp.ne.s32.totalorder %s1443_s28, %s1114_s19  ;;  %p1504_p0 = scmp.ne.s32.totalorder %s1499_s13, 0 }
  0x71   : > { %936 = vmatprep.subr.bf16.mxu0 %v1191_v0  ;;  %s1200_s25 = smov [#allocation8]  }
  0x72   : > { %p1116_p1 = pnand %p1115_p11, %p1504_p0 }
  0x73   : > { %897 = vmatmul.mubr.msk.f32.vlgmr.msra.gmra.mrb[0].mxu0 %vm247_vm1, %v242_v8 }
  0x74   : > { %927 = vmatprep.mubr.msk.f32.mxu0 %vm1192_vm0, %v1193_v1  ;;  %938 = vmatpush3.bf16.msra.mxu0 %v937_v43  ;;  %p1117_p3 = pneg %p1116_p1 }
  0x75   : > { %939 = vmatprep.subr.bf16.mxu0 %v1191_v0 }
  0x78   : > { %941 = vmatpush3.bf16.msra.mxu0 %v940_v45 }
 0x146   : > { %v317_v9 = vpop.f32.mrb[0].mxu0 }
 0x147   : > { %411 = vrot.lane.b32.xlu1 %v317_v9, %s1194_s21  ;;  %322 = vrot.lane.b32.xlu0 %v317_v9, %s1195_s23  ;;  %v898_v10 = vpop.f32.mrb[1].mxu0  ;;  %s1118_s21 = sshll.u32 %s1200_s25, 4  ;;  %s1119_s21 = int_to_ptr.vmem [resolvable:$false] %s1118_s21 }
 0x148   : > { %s1120_s23 = scalar_lea.vmem %s1119_s21, 256  ;;  %p1121_p7 = scmp.lt.s32.totalorder %s1443_s28, %s1119_s21 }
 0x149   : > { %p1122_p9 = scmp.lt.s32.totalorder %s1120_s23, %s1114_s19 }
 0x14b   : > { %489 = vrot.lane.b32.xlu1 %v317_v9, %s1196_s27  ;;  %p1123_p12 = por %p1122_p9, %p1121_p7 }
 0x14d   : > { %p1124_p2 = pnand %p1123_p12, %p1117_p3 }
 0x1b9   : > { %v323_v11 = vpop.permute.xlu0 %322  ;;  %v412_v12 = vpop.permute.xlu1 %411 }
 0x1ba   : > { %900 = vmatpush3.xpose.msk.msra.mxu1 %vm324_vm2, %v323_v11 }
 0x1bb   : > { %904 = vmatprep.subr.mxu1 %v1193_v1 }
 0x1bd   : > { %902 = vmatmul.mubr.msk.f32.vlgmr.msra.gmra.mrb[0].mxu1 %vm324_vm2, %v317_v9  ;;  %v490_v21 = vpop.permute.xlu1 %489 }
 0x1be   : > { %905 = vmatpush3.msra.mxu1 %v412_v12  ;;  %906 = vmatprep.mubr.msk.f32.mxu1 %vm1192_vm0, %v1193_v1 }
 0x1bf   : > { %909 = vmatprep.subr.mxu1 %v1193_v1 }
 0x290   : > { %v395_v13 = vpop.f32.mrb[0].mxu1 }
 0x291   : > { %v903_v14 = vpop.f32.mrb[1].mxu1  ;;  %v400_v15 = vsel %vm399_vm3, %v395_v13, -inf }
 0x292   : > { %401 = vmax.xlane.f32.xlu0 %v400_v15 }
 0x31f   : > { %v402_v16 = vpop.xlane.xlu0 %401 }
 0x320   : > { %v403_v17 = vsub.f32 %v395_v13, %v402_v16 }
 0x322   : > { %v404_v18 = vmul.f32 1.442695, %v403_v17 }
 0x324   : > { %1020 = vpow2.f32 %v404_v18 }
 0x32e   : > { %v1021_v19 = vpop.eup %1020 }
 0x32f   : > { %v406_v20 = vsel %vm399_vm3, %v1021_v19, 0.0 }
 0x330   : > { %407 = vadd.xlane.f32.xlu1 %v406_v20 }
 0x341   : > { %487 = vrot.lane.b32.xlu1 %v317_v9, %s1197_s30 }
 0x3bd   : > { %v408_v22 = vpop.xlane.xlu1 %407 }
 0x3be   : > { %1022 = vrcp.f32 %v408_v22 }
 0x3c1   : > { %v488_v25 = vpop.permute.xlu1 %487 }
 0x3c8   : > { %v1023_v23 = vpop.eup %1022 }
 0x3c9   : > { %v410_v24 = vmul.f32 %v1023_v23, %v1021_v19 }
 0x3cb   : > { %907 = vmatmul.mubr.msk.f32.vlgmr.msra.gmra.mrb[2].mxu1 %vm399_vm3, %v410_v24 }
 0x3cc   : > { %910 = vmatpush3.xpose.msk.msra.mxu1 %vm324_vm2, %v490_v21  ;;  %911 = vmatprep.mubr.msk.f32.mxu1 %vm1192_vm0, %v1193_v1 }
 0x3cd   : > { %914 = vmatprep.subr.mxu1 %v1193_v1 }
 0x3cf   : > { %912 = vmatmul.mubr.msk.f32.vlgmr.msra.gmra.mrb[4].mxu1 %vm324_vm2, %v488_v25 }
 0x3d0   : > { %916 = vmatprep.mubr.msk.f32.mxu1 %vm1192_vm0, %v1193_v1 }
 0x49e   : > { %v483_v26 = vpop.f32.mrb[2].mxu1 }
 0x49f   : > { %v908_v27 = vpop.f32.mrb[3].mxu1 }
 0x4a2   : > { %v561_v28 = vpop.f32.mrb[4].mxu1 }
 0x4a3   : > { %v913_v29 = vpop.f32.mrb[5].mxu1  ;;  %v565_v30 = vsel %vm399_vm3, %v561_v28, -inf }
 0x4a4   : > { %566 = vmax.xlane.f32.xlu1 %v565_v30 }
 0x531   : > { %v567_v31 = vpop.xlane.xlu1 %566 }
 0x532   : > { %v568_v32 = vsub.f32 %v561_v28, %v567_v31 }
 0x534   : > { %v569_v33 = vmul.f32 1.442695, %v568_v32 }
 0x536   : > { %1024 = vpow2.f32 %v569_v33 }
 0x540   : > { %v1025_v34 = vpop.eup %1024 }
 0x541   : > { %v571_v35 = vsel %vm399_vm3, %v1025_v34, 0.0 }
 0x542   : > { %572 = vadd.xlane.f32.xlu0 %v571_v35 }
 0x558   : > { %576 = vrot.lane.b32.xlu0 %v317_v9, %s1198_s5 }
 0x5cf   : > { %v573_v36 = vpop.xlane.xlu0 %572 }
 0x5d0   : > { %1026 = vrcp.f32 %v573_v36 }
 0x5d3   : > { %v577_v37 = vpop.permute.xlu0 %576 }
 0x5d4   : > { %915 = vmatpush3.msra.mxu1 %v577_v37 }
 0x5da   : > { %v1027_v38 = vpop.eup %1026 }
 0x5db   : > { %v575_v39 = vmul.f32 %v1027_v38, %v1025_v34 }
 0x5dd   : > { %917 = vmatmul.mubr.msk.f32.vlgmr.msra.gmra.mrb[6].mxu1 %vm399_vm3, %v575_v39 }
 0x6b0   : > { %v648_v46 = vpop.f32.mrb[6].mxu1 }
 0x6b1   : > { %653 = vrot.lane.b32.xlu0 %v648_v46, %s1199_s6  ;;  %v918_v47 = vpop.f32.mrb[7].mxu1 }
 0x723   : > { %v654_v48 = vpop.permute.xlu0 %653 }
 0x724   : > { %v656_v49 = vsel %vm324_vm2, %v483_v26, %v654_v48 }
 0x725   : > { %928 = vmatmul.mubr.msk.f32.vlgmr.msra.gmra.mrb[2].mxu0 %vm247_vm1, %v656_v49 }
 0x7f8   : > { %v737_v51 = vpop.f32.mrb[2].mxu0 }
 0x7f9   : > { %v738_v52 = vadd.f32 %v864_v50, %v737_v51  ;;  %v929_v53 = vpop.f32.mrb[3].mxu0 }
 0x7fb   : > { %741 = vst.msk [vmem:[%s241_s20] sm:$0xff] %vm247_vm1, %v738_v52 }
 0x7fc   : > { %1127 = shalt.err (!%p1124_p2)
}
 0x7fd   : > { %s1128_s29 = scalar_lea.hbm %s1441_s7, 128  ;;  %s1132_s5 = scalar_lea.hbm %s1490_s4, 256 }
 0x7fe   : > { %p1129_p13 = scmp.ne.s32.totalorder %s1441_s7, %s1128_s29  ;;  %p1133_p4 = scmp.lt.u32.totalorder %s1441_s7, %s1490_s4 }
 0x7ff   : > { %p1134_p5 = scmp.lt.u32.totalorder %s1132_s5, %s1128_s29  ;;  %p1136_p11 = scmp.lt.u32.totalorder %s1128_s29, %s1441_s7 }
 0x800   : > { %p1130_p6 = pnand %p1129_p13, %p1504_p0 }
 0x801   : > { %p1135_p8 = por %p1134_p5, %p1133_p4 }
 0x802   : > { %p1131_p10 = pneg %p1130_p6 }
 0x803   : > { %p1137_p1 = por %p1136_p11, %p1135_p8 }
 0x805   : > { %p1138_p3 = pnand %p1137_p1, %p1131_p10 }
 0x807   : > { %1141 = shalt.err (!%p1138_p3)
}
 0x808   : > { %952 = dma.vmem_to_hbm [thread:$0]  (%p1504_p0), %s1443_s28, 128, %s1441_s7, %s743_s8  }
 0x809 PF: > { %s768_s10 = sand.u32 1, %s1172_s15   ;;  %p1505_p7 = scmp.ne.s32.totalorder %s1495_s22, 0 }
 0x80a   : > { %p1506_p9 = scmp.ge.s32.totalorder %s1184_s18, 2  ;;  %s769_s24 = scalar_lea.sflag [#allocation4], %s768_s10 }
 0x80c   : > { %p966_p12 = pnand %p1506_p9, %p1505_p7 }
 0x80e   : > { %1167 = dma.done.wait (!%p966_p12), %s769_s24, 128  }
 0x80f   : > { %1169 = vsyncadd (!%p966_p12), %s769_s24, 4294967168  ;;  %p18_p2 = scmp.ge.s32.totalorder %s1336_s9, 4   ;;  %s1507_s15 = smov %s1176_s16 }
 0x810   : > { %s1508_s16 = smov %s1180_s17  ;;  %s1509_s17 = smov %s1352_s14 }
 0x811   : > { %s1510_s18 = smov %s1336_s9  ;;  %20 = sbr.rel (!%p18_p2) target bundleno = 6 (0x6), region = 89 }
 0x818   :  { %774 = vsyncpa [#allocation3], 1 }
 0x819   :  { %776 = vsyncpa [#allocation3 + $0x1], 1 }
 0x81a   :  { %777 = vsyncpa [#allocation6], 1 }
 0x81b   :  { %778 = vsyncpa [#allocation4], 1 }
 0x81c   :  { %780 = vsyncpa [#allocation4 + $0x1], 1 }

</bundles_post_ra>
